<compile_context>
chip_gen: v7x
topology: tpu7x:2x2x1
jax: 0.10.0
libtpu: 0.0.40
codegen_flags: <defaults>
</compile_context>

<pallas_src>
import functools

import jax
import jax.numpy as jnp
from jax.experimental import pallas as pl
from jax.experimental.pallas import tpu as pltpu

OB_SHAPE = 10
HIDDEN = 16
N_ACS = 4 ** 3  # 64
SUBLANE = 8
MULTI_TILE_MIN = 2048  # above this batch size, force >=2 tiles (v7x megacore)


def _round_up(x, m):
    return ((x + m - 1) // m) * m


def _qnet_kernel(x_ref, w1_ref, b1_ref, w2_ref, b2_ref, w3_ref, b3_ref, out_ref):
    # Batch-on-sublane layout: x [TB, 10], activations [TB, 16], q [TB, 64].
    # HBM DMA is the binding resource; MXU/VPU work below is hidden under it.
    hp = jax.lax.Precision.HIGHEST
    x = x_ref[...]

    h1 = jnp.dot(x, w1_ref[...], preferred_element_type=jnp.float32,
                 precision=hp) + b1_ref[...]
    h1 = jnp.maximum(h1, 0.0)

    h2 = jnp.dot(h1, w2_ref[...], preferred_element_type=jnp.float32,
                 precision=hp) + b2_ref[...]
    h2 = jnp.maximum(h2, 0.0)

    q = jnp.dot(h2, w3_ref[...], preferred_element_type=jnp.float32,
                precision=hp) + b3_ref[...]
    out_ref[...] = q.astype(out_ref.dtype)


@functools.partial(jax.jit, static_argnames=("tile_b",))
def qnet_ind_forward(obs, params, tile_b=8192):
    """obs: [B, 10] float32 -> q-values [B, 64] float32.

    Weights are PyTorch-layout: W [out, in], b [out].
    """
    w1, b1, w2, b2, w3, b3 = params
    B = obs.shape[0]

    # Tiny (<5 KB) layout plumbing only: kernel consumes [in, out] weights and
    # [1, out] biases so no batch-sized tensor is ever transposed or padded.
    w1t, w2t, w3t = w1.T, w2.T, w3.T
    b1r, b2r, b3r = b1.reshape(1, -1), b2.reshape(1, -1), b3.reshape(1, -1)

    # Batch tile on sublanes: a multiple of 8, as large as possible so the
    # per-grid-step pipeline overhead (~0.35 us) is amortised.
    TB = min(_round_up(tile_b, SUBLANE), _round_up(B, SUBLANE))
    # Keep >= 2 tiles for large batches so dimension_semantics=("parallel",)
    # can shard tiles across v7x's two TensorCores (harmless on v5e/v6e).
    if B > MULTI_TILE_MIN and B <= TB:
        TB = _round_up((B + 1) // 2, SUBLANE)
    num_tiles = pl.cdiv(B, TB)  # ragged last block is clipped by Pallas

    weight_elems = (HIDDEN * OB_SHAPE + HIDDEN
                    + HIDDEN * HIDDEN + HIDDEN
                    + N_ACS * HIDDEN + N_ACS)
    cost = pl.CostEstimate(
        flops=2 * B * (OB_SHAPE * HIDDEN + HIDDEN * HIDDEN + HIDDEN * N_ACS),
        transcendentals=0,
        bytes_accessed=4 * (B * (OB_SHAPE + N_ACS) + weight_elems),
    )

    def const(a):  # full-extent block, constant index map -> VMEM-resident
        return pl.BlockSpec(a.shape, lambda i: (0,) * a.ndim)

    out = pl.pallas_call(
        _qnet_kernel,
        out_shape=jax.ShapeDtypeStruct((B, N_ACS), jnp.float32),
        grid=(num_tiles,),
        in_specs=[
            pl.BlockSpec((TB, OB_SHAPE), lambda i: (i, 0)),  # obs tile (pipelined)
            const(w1t),  # [10, 16]
            const(b1r),  # [1, 16]
            const(w2t),  # [16, 16]
            const(b2r),  # [1, 16]
            const(w3t),  # [16, 64]
            const(b3r),  # [1, 64]
        ],
        out_specs=pl.BlockSpec((TB, N_ACS), lambda i: (i, 0)),
        compiler_params=pltpu.CompilerParams(
            dimension_semantics=("parallel",),   # megacore on v7x
            vmem_limit_bytes=32 * 1024 * 1024,   # covers v5e's 16 MiB default
        ),
        cost_estimate=cost,
    )(obs, w1t, b1r, w2t, b2r, w3t, b3r)
    return out


def init_params(key):
    """PyTorch-style init U(-1/sqrt(fan_in), 1/sqrt(fan_in)).

    Weights stored as [out_features, in_features]; biases as [out_features].
    """
    def linear_init(k, fan_in, fan_out):
        kw, kb = jax.random.split(k)
        bound = 1.0 / jnp.sqrt(jnp.float32(fan_in))
        w = jax.random.uniform(kw, (fan_out, fan_in), jnp.float32, -bound, bound)
        b = jax.random.uniform(kb, (fan_out,), jnp.float32, -bound, bound)
        return w, b

    k1, k2, k3 = jax.random.split(key, 3)
    w1, b1 = linear_init(k1, OB_SHAPE, HIDDEN)
    w2, b2 = linear_init(k2, HIDDEN, HIDDEN)
    w3, b3 = linear_init(k3, HIDDEN, N_ACS)
    return (w1, b1, w2, b2, w3, b3)


def reference_forward(obs, params):
    w1, b1, w2, b2, w3, b3 = params
    hp = jax.lax.Precision.HIGHEST
    h1 = jnp.maximum(jnp.dot(obs, w1.T, precision=hp) + b1, 0.0)
    h2 = jnp.maximum(jnp.dot(h1, w2.T, precision=hp) + b2, 0.0)
    return jnp.dot(h2, w3.T, precision=hp) + b3


if __name__ == "__main__":
    key = jax.random.PRNGKey(0)
    k_obs, k_obs2, k_params = jax.random.split(key, 3)
    params = init_params(k_params)

    # Small-batch test (single tile).  NOTE: at B=8 wall time is pure launch
    # overhead; batch many env observations before calling this in production.
    B = 8
    obs = jax.random.normal(k_obs, (B, OB_SHAPE), jnp.float32)
    q = jax.block_until_ready(qnet_ind_forward(obs, params))
    q_ref = reference_forward(obs, params)
    assert q.shape == (B, N_ACS)
    assert jnp.allclose(q, q_ref, atol=1e-5, rtol=1e-5), "mismatch vs JAX reference (B=8)"

    # Multi-tile test: exercises the batch grid + ragged (clipped) last block.
    B2 = 300
    obs2 = jax.random.normal(k_obs2, (B2, OB_SHAPE), jnp.float32)
    q2 = jax.block_until_ready(qnet_ind_forward(obs2, params, tile_b=128))
    q2_ref = reference_forward(obs2, params)
    assert q2.shape == (B2, N_ACS)
    assert jnp.allclose(q2, q2_ref, atol=1e-5, rtol=1e-5), "mismatch vs JAX reference (B=300)"

    print("KERNEL_OK")
</pallas_src>

<mosaic_0001>
module attributes {stable_mosaic.version = 11 : i64} {
  func.func @_qnet_kernel(%arg0: i32, %arg1: memref<8x10xf32, #tpu.memory_space<vmem>>, %arg2: memref<10x16xf32, #tpu.memory_space<vmem>>, %arg3: memref<1x16xf32, #tpu.memory_space<vmem>>, %arg4: memref<16x16xf32, #tpu.memory_space<vmem>>, %arg5: memref<1x16xf32, #tpu.memory_space<vmem>>, %arg6: memref<16x64xf32, #tpu.memory_space<vmem>>, %arg7: memref<1x64xf32, #tpu.memory_space<vmem>>, %arg8: memref<8x64xf32, #tpu.memory_space<vmem>>) attributes {dimension_semantics = [#tpu.dimension_semantics<parallel>], iteration_bounds = array<i64: 1>, scalar_prefetch = 0 : i64, scratch_operands = 0 : i64, tpu.core_type = #tpu.core_type<tc>, window_params = [{transform_indices = @transform_0, window_bounds = array<i64: 8, 10>}, {pipeline_mode = #tpu.pipeline_mode<synchronous>, transform_indices = @transform_1, window_bounds = array<i64: 10, 16>}, {pipeline_mode = #tpu.pipeline_mode<synchronous>, transform_indices = @transform_2, window_bounds = array<i64: 1, 16>}, {pipeline_mode = #tpu.pipeline_mode<synchronous>, transform_indices = @transform_3, window_bounds = array<i64: 16, 16>}, {pipeline_mode = #tpu.pipeline_mode<synchronous>, transform_indices = @transform_4, window_bounds = array<i64: 1, 16>}, {pipeline_mode = #tpu.pipeline_mode<synchronous>, transform_indices = @transform_5, window_bounds = array<i64: 16, 64>}, {pipeline_mode = #tpu.pipeline_mode<synchronous>, transform_indices = @transform_6, window_bounds = array<i64: 1, 64>}, {transform_indices = @transform_7, window_bounds = array<i64: 8, 64>}]} {
    %c0 = arith.constant 0 : index
    %c0_0 = arith.constant 0 : index
    %0 = vector.load %arg1[%c0, %c0_0] : memref<8x10xf32, #tpu.memory_space<vmem>>, vector<8x10xf32>
    %c0_1 = arith.constant 0 : index
    %c0_2 = arith.constant 0 : index
    %1 = vector.load %arg2[%c0_1, %c0_2] : memref<10x16xf32, #tpu.memory_space<vmem>>, vector<10x16xf32>
    %cst = arith.constant dense<0.000000e+00> : vector<8x16xf32>
    %2 = tpu.matmul %0, %1, %cst {dimension_numbers = #tpu.dot_dimension_numbers<[1], [0], [0], [1], [0, 0, 1, 1], [], []>, precision = #tpu.contract_precision<fp32>} : vector<8x10xf32>, vector<10x16xf32>, vector<8x16xf32> -> vector<8x16xf32>
    %c0_3 = arith.constant 0 : index
    %c0_4 = arith.constant 0 : index
    %3 = vector.load %arg3[%c0_3, %c0_4] : memref<1x16xf32, #tpu.memory_space<vmem>>, vector<1x16xf32>
    %4 = vector.broadcast %3 : vector<1x16xf32> to vector<8x16xf32>
    %5 = arith.addf %2, %4 : vector<8x16xf32>
    %cst_5 = arith.constant 0.000000e+00 : f32
    %6 = vector.broadcast %cst_5 : f32 to vector<8x16xf32>
    %7 = arith.maximumf %5, %6 : vector<8x16xf32>
    %c0_6 = arith.constant 0 : index
    %c0_7 = arith.constant 0 : index
    %8 = vector.load %arg4[%c0_6, %c0_7] : memref<16x16xf32, #tpu.memory_space<vmem>>, vector<16x16xf32>
    %cst_8 = arith.constant dense<0.000000e+00> : vector<8x16xf32>
    %9 = tpu.matmul %7, %8, %cst_8 {dimension_numbers = #tpu.dot_dimension_numbers<[1], [0], [0], [1], [0, 0, 1, 1], [], []>, precision = #tpu.contract_precision<fp32>} : vector<8x16xf32>, vector<16x16xf32>, vector<8x16xf32> -> vector<8x16xf32>
    %c0_9 = arith.constant 0 : index
    %c0_10 = arith.constant 0 : index
    %10 = vector.load %arg5[%c0_9, %c0_10] : memref<1x16xf32, #tpu.memory_space<vmem>>, vector<1x16xf32>
    %11 = vector.broadcast %10 : vector<1x16xf32> to vector<8x16xf32>
    %12 = arith.addf %9, %11 : vector<8x16xf32>
    %cst_11 = arith.constant 0.000000e+00 : f32
    %13 = vector.broadcast %cst_11 : f32 to vector<8x16xf32>
    %14 = arith.maximumf %12, %13 : vector<8x16xf32>
    %c0_12 = arith.constant 0 : index
    %c0_13 = arith.constant 0 : index
    %15 = vector.load %arg6[%c0_12, %c0_13] : memref<16x64xf32, #tpu.memory_space<vmem>>, vector<16x64xf32>
    %cst_14 = arith.constant dense<0.000000e+00> : vector<8x64xf32>
    %16 = tpu.matmul %14, %15, %cst_14 {dimension_numbers = #tpu.dot_dimension_numbers<[1], [0], [0], [1], [0, 0, 1, 1], [], []>, precision = #tpu.contract_precision<fp32>} : vector<8x16xf32>, vector<16x64xf32>, vector<8x64xf32> -> vector<8x64xf32>
    %c0_15 = arith.constant 0 : index
    %c0_16 = arith.constant 0 : index
    %17 = vector.load %arg7[%c0_15, %c0_16] : memref<1x64xf32, #tpu.memory_space<vmem>>, vector<1x64xf32>
    %18 = vector.broadcast %17 : vector<1x64xf32> to vector<8x64xf32>
    %19 = arith.addf %16, %18 : vector<8x64xf32>
    %c0_17 = arith.constant 0 : index
    %c0_18 = arith.constant 0 : index
    %20 = vector.load %arg8[%c0_17, %c0_18] : memref<8x64xf32, #tpu.memory_space<vmem>>, vector<8x64xf32>
    tpu.vector_store %arg8[%c0_17, %c0_18], %19 {strides = array<i32>} : memref<8x64xf32, #tpu.memory_space<vmem>>, vector<8x64xf32>,
    return
  }
  func.func @transform_0(%arg0: i32) -> (i32, i32) {
    %c0_i32 = arith.constant 0 : i32
    %c0_i32_0 = arith.constant 0 : i32
    return %arg0, %c0_i32 : i32, i32
  }
  func.func @transform_1(%arg0: i32) -> (i32, i32) {
    %c0_i32 = arith.constant 0 : i32
    %c0_i32_0 = arith.constant 0 : i32
    %c0_i32_1 = arith.constant 0 : i32
    return %c0_i32, %c0_i32_0 : i32, i32
  }
  func.func @transform_2(%arg0: i32) -> (i32, i32) {
    %c0_i32 = arith.constant 0 : i32
    %c0_i32_0 = arith.constant 0 : i32
    %c0_i32_1 = arith.constant 0 : i32
    return %c0_i32, %c0_i32_0 : i32, i32
  }
  func.func @transform_3(%arg0: i32) -> (i32, i32) {
    %c0_i32 = arith.constant 0 : i32
    %c0_i32_0 = arith.constant 0 : i32
    %c0_i32_1 = arith.constant 0 : i32
    return %c0_i32, %c0_i32_0 : i32, i32
  }
  func.func @transform_4(%arg0: i32) -> (i32, i32) {
    %c0_i32 = arith.constant 0 : i32
    %c0_i32_0 = arith.constant 0 : i32
    %c0_i32_1 = arith.constant 0 : i32
    return %c0_i32, %c0_i32_0 : i32, i32
  }
  func.func @transform_5(%arg0: i32) -> (i32, i32) {
    %c0_i32 = arith.constant 0 : i32
    %c0_i32_0 = arith.constant 0 : i32
    %c0_i32_1 = arith.constant 0 : i32
    return %c0_i32, %c0_i32_0 : i32, i32
  }
  func.func @transform_6(%arg0: i32) -> (i32, i32) {
    %c0_i32 = arith.constant 0 : i32
    %c0_i32_0 = arith.constant 0 : i32
    %c0_i32_1 = arith.constant 0 : i32
    return %c0_i32, %c0_i32_0 : i32, i32
  }
  func.func @transform_7(%arg0: i32) -> (i32, i32) {
    %c0_i32 = arith.constant 0 : i32
    %c0_i32_0 = arith.constant 0 : i32
    return %arg0, %c0_i32 : i32, i32
  }
}

</mosaic_0001>

<bundles_post_ra>
// kernel: qnet_ind_forward.1
= control target key start
LH: loop header
LB: loop body
LE: loop exit
PB: predicated region body
PF: predicated region fallthrough
CT: control target
= control target key end

     0   :  { %vm41_vm0 = vcmask 1041408   ;;  %v1762_v2 = vmov 0.0|0.0   ;;  %vm37_vm1 = vcmask 80896   ;;  %vm1763_vm2 = vmmov 0   ;;  %s1904_s0 = inlined_call_operand.vmem [shape: f32[8,10], index: 0, kind: input, shape index: {}]   ;;  %s1905_s1 = inlined_call_operand.vmem [shape: f32[10,16], index: 1, kind: input, shape index: {}]   ;;  %s1906_s2 = inlined_call_operand.vmem [shape: f32[1,16], index: 2, kind: input, shape index: {}]   ;;  %s1907_s3 = inlined_call_operand.vmem [shape: f32[16,16], index: 3, kind: input, shape index: {}]   ;;  %s1908_s4 = inlined_call_operand.vmem [shape: f32[1,16], index: 4, kind: input, shape index: {}]   ;;  %s1909_s5 = inlined_call_operand.vmem [shape: f32[16,64], index: 5, kind: input, shape index: {}]   ;;  %s1910_s6 = inlined_call_operand.vmem [shape: f32[1,64], index: 6, kind: input, shape index: {}]   ;;  %s1911_s7 = inlined_call_operand.hbm [shape: f32[8,64], index: 7, kind: output, shape index: {}]  }
   0x1   :  { %v28_v0 = vld [vmem:[%s1905_s1] sm:$0xff]  ;;  %v29_v1 = vld [vmem:[%s1905_s1 + $0x8] sm:$0x3]  ;;  %1657 = vmatprep.subr.bf16.mxu0 %v1762_v2  ;;  %1648 = vmatprep.subr.bf16.mxu1 %v1762_v2  ;;  %v1764_v7 = vmov 0.0  }
   0x2   :  { %v43_v3 = vsel %vm41_vm0, %v29_v1, 0  ;;  %v46_v4 = vand.u32 4294901760, %v28_v0  ;;  %v27_v5 = vld [vmem:[%s1904_s0] sm:$0xff]  ;;  %1547 = vmatprep.mubr.msk.f32.mxu0 %vm1763_vm2, %v1764_v7  ;;  %1526 = vmatprep.mubr.msk.f32.mxu1 %vm1763_vm2, %v1764_v7 }
   0x3   :  { %v49_v6 = vand.u32 4294901760, %v43_v3  ;;  %v39_v8 = vsel %vm37_vm1, %v27_v5, 0 }
   0x4   :  { %12 = vsyncpa [#allocation3], 0  ;;  %v124_v9 = vsub.f32 %v28_v0, %v46_v4  ;;  %v112_v10 = vand.u32 4294901760, %v39_v8  ;;  %v505_v26 = vld [vmem:[%s1907_s3] sm:$0xff]  ;;  %v506_v27 = vld [vmem:[%s1907_s3 + $0x8] sm:$0xff]  ;;  %vm514_vm3 = vcmask 130048  }
   0x5   :  { %v1649_v11 = vpack.c.bf16 %v49_v6, %v46_v4  ;;  %v131_v12 = vsub.f32 %v43_v3, %v49_v6  ;;  %v519_v28 = vand.u32 4294901760, %v505_v26  ;;  %v522_v29 = vand.u32 4294901760, %v506_v27  ;;  %v1465_v44 = vld [vmem:[%s1906_s2] ss:$0 sm:$0xff]  ;;  %v979_v57 = vld [vmem:[%s1909_s5 + $0x8] sm:$0xff]  ;;  %s1765_s15 = smov [#allocation2]  }
   0x6   :  { %v113_v13 = vsub.f32 %v39_v8, %v112_v10  ;;  %v125_v14 = vand.u32 4294901760, %v124_v9  ;;  %v978_v56 = vld [vmem:[%s1909_s5] sm:$0xff]  ;;  %v994_v59 = vand.u32 4294901760, %v979_v57  ;;  %s1457_s16 = sshll.u32 %s1765_s15, 4  ;;  %vm1449_vm4 = vcmask 523264   ;;  %s1458_s16 = int_to_ptr.vmem [resolvable:$true] %s1457_s16 }
   0x7   :  { %1659 = vmatpush3.bf16.msra.mxu0 %v1649_v11  ;;  %1650 = vmatpush3.bf16.msra.mxu1 %v1649_v11  ;;  %v132_v15 = vand.u32 4294901760, %v131_v12  ;;  %v1655_v25 = vpack.c.bf16 %v131_v12, %v124_v9  ;;  %v1667_v30 = vpack.c.bf16 %v522_v29, %v519_v28  ;;  %v597_v31 = vsub.f32 %v505_v26, %v519_v28  ;;  %s1738_s17 = scalar_lea.vmem %s1458_s16, 128  ;;  %p1743_p1 = scmp.lt.s32.totalorder %s1458_s16, %s1458_s16 }
   0x8   :  { %v114_v16 = vand.u32 4294901760, %v113_v13  ;;  %1651 = vmatprep.subr.bf16.mxu1 %v1762_v2  ;;  %1660 = vmatprep.subr.bf16.mxu0 %v1762_v2  ;;  %v126_v17 = vsub.f32 %v124_v9, %v125_v14  ;;  %v604_v32 = vsub.f32 %v506_v27, %v522_v29  ;;  %v991_v58 = vand.u32 4294901760, %v978_v56  ;;  %p1739_p0 = scmp.ne.s32.totalorder %s1458_s16, %s1738_s17  ;;  %p1744_p2 = scmp.lt.s32.totalorder %s1738_s17, %s1738_s17 }
   0x9   :  { %v133_v18 = vsub.f32 %v131_v12, %v132_v15  ;;  %v1661_v19 = vpack.c.bf16 %v132_v15, %v125_v14  ;;  %v598_v33 = vand.u32 4294901760, %v597_v31  ;;  %v1076_v62 = vsub.f32 %v979_v57, %v994_v59 }
   0xa   :  { %1548 = vmatmul.mubr.f32.vlgmr.msra.gmra.mrb[0].mxu0 %v114_v16  ;;  %v115_v20 = vsub.f32 %v113_v13, %v114_v16  ;;  %v127_v21 = vand.u32 4294901760, %v126_v17  ;;  %v605_v34 = vand.u32 4294901760, %v604_v32  ;;  %v1673_v40 = vpack.c.bf16 %v604_v32, %v597_v31  ;;  %p1745_p3 = por %p1744_p2, %p1743_p1 }
   0xb   :  { %v134_v22 = vand.u32 4294901760, %v133_v18  ;;  %1662 = vmatpush3.bf16.msra.mxu0 %v1661_v19  ;;  %1554 = vmatprep.mubr.msk.f32.mxu0 %vm1763_vm2, %v1764_v7  ;;  %v599_v35 = vsub.f32 %v597_v31, %v598_v33  ;;  %v1685_v60 = vpack.c.bf16 %v994_v59, %v991_v58  ;;  %v1069_v61 = vsub.f32 %v978_v56, %v991_v58 }
   0xc   :  { %v116_v23 = vand.u32 4294901760, %v115_v20  ;;  %1663 = vmatprep.subr.bf16.mxu0 %v1762_v2  ;;  %v606_v36 = vsub.f32 %v604_v32, %v605_v34  ;;  %v1679_v41 = vpack.c.bf16 %v605_v34, %v598_v33  ;;  %v1077_v0 = vand.u32 4294901760, %v1076_v62  ;;  %p1746_p4 = pnand %p1745_p3, %p1739_p0 }
   0xd   :  { %v1652_v24 = vpack.c.bf16 %v134_v22, %v127_v21  ;;  %v600_v37 = vand.u32 4294901760, %v599_v35  ;;  %v1070_v63 = vand.u32 4294901760, %v1069_v61  ;;  %v1691_v8 = vpack.c.bf16 %v1076_v62, %v1069_v61  ;;  %v1467_v21 = vld [vmem:[%s1910_s6] ss:$0 sm:$0xff] }
   0xe   :  { %1527 = vmatmul.mubr.f32.vlgmr.msra.gmra.mrb[0].mxu1 %v116_v23  ;;  %v607_v38 = vand.u32 4294901760, %v606_v36  ;;  %v1078_v3 = vsub.f32 %v1076_v62, %v1077_v0 }
   0xf   :  { %1653 = vmatpush3.bf16.msra.mxu1 %v1652_v24  ;;  %1533 = vmatprep.mubr.msk.f32.mxu1 %vm1763_vm2, %v1764_v7  ;;  %v1071_v1 = vsub.f32 %v1069_v61, %v1070_v63  ;;  %v1697_v9 = vpack.c.bf16 %v1077_v0, %v1070_v63 }
  0x10   :  { %1654 = vmatprep.subr.bf16.mxu1 %v1762_v2  ;;  %v1670_v39 = vpack.c.bf16 %v607_v38, %v600_v37  ;;  %v1079_v5 = vand.u32 4294901760, %v1078_v3 }
  0x11   :  { %v1072_v4 = vand.u32 4294901760, %v1071_v1 }
  0x12   :  { %1555 = vmatmul.mubr.f32.vlgmr.msra.gmra.mrb[0].mxu0 %v112_v10 }
  0x13   :  { %1665 = vmatpush3.bf16.msra.mxu0 %v1649_v11  ;;  %1561 = vmatprep.mubr.msk.f32.mxu0 %vm1763_vm2, %v1764_v7  ;;  %v1688_v6 = vpack.c.bf16 %v1079_v5, %v1072_v4 }
  0x14   :  { %1684 = vmatprep.subr.bf16.mxu0 %v1762_v2 }
  0x16   :  { %1534 = vmatmul.mubr.f32.vlgmr.msra.gmra.mrb[0].mxu1 %v112_v10 }
  0x17   :  { %1656 = vmatpush3.bf16.msra.mxu1 %v1655_v25  ;;  %1540 = vmatprep.mubr.msk.f32.mxu1 %vm1763_vm2, %v1764_v7 }
  0x18   :  { %1666 = vmatprep.subr.bf16.mxu1 %v1762_v2 }
  0x1a   :  { %1562 = vmatmul.mubr.f32.vlgmr.msra.gmra.mrb[0].mxu0 %v112_v10  ;;  %v1466_v10 = vld [vmem:[%s1908_s4] ss:$0 sm:$0xff] }
  0x1b   :  { %1610 = vmatprep.mubr.msk.f32.mxu0 %vm1763_vm2, %v1764_v7  ;;  %1686 = vmatpush3.bf16.msra.mxu0 %v1685_v60 }
  0x1c   :  { %1687 = vmatprep.subr.bf16.mxu0 %v1762_v2 }
  0x1e   :  { %1541 = vmatmul.mubr.f32.vlgmr.msra.gmra.mrb[0].mxu1 %v113_v13 }
  0x1f   :  { %1568 = vmatprep.mubr.msk.f32.mxu1 %vm1763_vm2, %v1764_v7  ;;  %1668 = vmatpush3.bf16.msra.mxu1 %v1667_v30 }
  0x20   :  { %1669 = vmatprep.subr.bf16.mxu1 %v1762_v2 }
  0xed   :  { %v500_v42 = vpop.f32.mrb[0].mxu0 }
  0xee   :  { %v1563_v43 = vpop.f32.mrb[1].mxu0 }
  0xf1   :  { %v275_v45 = vpop.f32.mrb[0].mxu1 }
  0xf2   :  { %v1702_v46 = vadd.f32 %v1465_v44, %v275_v45  ;;  %v1542_v47 = vpop.f32.mrb[1].mxu1 }
  0xf4   :  { %v1703_v48 = vadd.f32 %v1702_v46, %v500_v42 }
  0xf6   :  { %v504_v49 = vmax.f32 %v1703_v48, 0.0 }
  0xf8   :  { %v516_v50 = vsel %vm514_vm3, %v504_v49, 0 }
  0xf9   :  { %v585_v51 = vand.u32 4294901760, %v516_v50 }
  0xfb   :  { %v586_v52 = vsub.f32 %v516_v50, %v585_v51 }
  0xfd   :  { %v587_v53 = vand.u32 4294901760, %v586_v52 }
  0xff   :  { %v588_v54 = vsub.f32 %v586_v52, %v587_v53 }
 0x101   :  { %v589_v55 = vand.u32 4294901760, %v588_v54 }
 0x103   :  { %1569 = vmatmul.mubr.f32.vlgmr.msra.gmra.mrb[2].mxu1 %v589_v55 }
 0x104   :  { %1671 = vmatpush3.bf16.msra.mxu1 %v1670_v39  ;;  %1575 = vmatprep.mubr.msk.f32.mxu1 %vm1763_vm2, %v1764_v7 }
 0x105   :  { %1672 = vmatprep.subr.bf16.mxu1 %v1762_v2 }
 0x10b   :  { %1576 = vmatmul.mubr.f32.vlgmr.msra.gmra.mrb[2].mxu1 %v585_v51 }
 0x10c   :  { %1674 = vmatpush3.bf16.msra.mxu1 %v1673_v40  ;;  %1582 = vmatprep.mubr.msk.f32.mxu1 %vm1763_vm2, %v1764_v7 }
 0x10d   :  { %1675 = vmatprep.subr.bf16.mxu1 %v1762_v2 }
 0x113   :  { %1583 = vmatmul.mubr.f32.vlgmr.msra.gmra.mrb[2].mxu1 %v586_v52 }
 0x114   :  { %1677 = vmatpush3.bf16.msra.mxu1 %v1667_v30  ;;  %1589 = vmatprep.mubr.msk.f32.mxu1 %vm1763_vm2, %v1764_v7 }
 0x115   :  { %1678 = vmatprep.subr.bf16.mxu1 %v1762_v2 }
 0x11b   :  { %1590 = vmatmul.mubr.f32.vlgmr.msra.gmra.mrb[2].mxu1 %v587_v53 }
 0x11c   :  { %1680 = vmatpush3.bf16.msra.mxu1 %v1679_v41  ;;  %1596 = vmatprep.mubr.msk.f32.mxu1 %vm1763_vm2, %v1764_v7 }
 0x11d   :  { %1681 = vmatprep.subr.bf16.mxu1 %v1762_v2 }
 0x123   :  { %1597 = vmatmul.mubr.f32.vlgmr.msra.gmra.mrb[2].mxu1 %v585_v51 }
 0x124   :  { %1683 = vmatpush3.bf16.msra.mxu1 %v1667_v30  ;;  %1603 = vmatprep.mubr.msk.f32.mxu1 %vm1763_vm2, %v1764_v7 }
 0x12b   :  { %1604 = vmatmul.mubr.f32.vlgmr.msra.gmra.mrb[2].mxu1 %v585_v51 }
 0x1fe   :  { %v973_v11 = vpop.f32.mrb[2].mxu1 }
 0x1ff   :  { %v1704_v12 = vadd.f32 %v1466_v10, %v973_v11  ;;  %v1605_v13 = vpop.f32.mrb[3].mxu1 }
 0x201   :  { %v977_v14 = vmax.f32 %v1704_v12, 0.0 }
 0x203   :  { %v988_v15 = vsel %vm514_vm3, %v977_v14, 0 }
 0x204   :  { %v1057_v16 = vand.u32 4294901760, %v988_v15 }
 0x206   :  { %v1058_v17 = vsub.f32 %v988_v15, %v1057_v16 }
 0x208   :  { %v1059_v18 = vand.u32 4294901760, %v1058_v17 }
 0x20a   :  { %v1060_v19 = vsub.f32 %v1058_v17, %v1059_v18 }
 0x20c   :  { %v1061_v20 = vand.u32 4294901760, %v1060_v19 }
 0x20e   :  { %1611 = vmatmul.mubr.f32.vlgmr.msra.gmra.mrb[2].mxu0 %v1061_v20 }
 0x20f   :  { %1689 = vmatpush3.bf16.msra.mxu0 %v1688_v6  ;;  %1617 = vmatprep.mubr.msk.f32.mxu0 %vm1763_vm2, %v1764_v7 }
 0x210   :  { %1690 = vmatprep.subr.bf16.mxu0 %v1762_v2 }
 0x216   :  { %1618 = vmatmul.mubr.f32.vlgmr.msra.gmra.mrb[2].mxu0 %v1057_v16 }
 0x217   :  { %1692 = vmatpush3.bf16.msra.mxu0 %v1691_v8  ;;  %1624 = vmatprep.mubr.msk.f32.mxu0 %vm1763_vm2, %v1764_v7 }
 0x218   :  { %1693 = vmatprep.subr.bf16.mxu0 %v1762_v2 }
 0x21e   :  { %1625 = vmatmul.mubr.f32.vlgmr.msra.gmra.mrb[2].mxu0 %v1058_v17 }
 0x21f   :  { %1695 = vmatpush3.bf16.msra.mxu0 %v1685_v60  ;;  %1631 = vmatprep.mubr.msk.f32.mxu0 %vm1763_vm2, %v1764_v7 }
 0x220   :  { %1696 = vmatprep.subr.bf16.mxu0 %v1762_v2 }
 0x226   :  { %1632 = vmatmul.mubr.f32.vlgmr.msra.gmra.mrb[2].mxu0 %v1059_v18 }
 0x227   :  { %1698 = vmatpush3.bf16.msra.mxu0 %v1697_v9  ;;  %1638 = vmatprep.mubr.msk.f32.mxu0 %vm1763_vm2, %v1764_v7 }
 0x228   :  { %1699 = vmatprep.subr.bf16.mxu0 %v1762_v2 }
 0x22e   :  { %1639 = vmatmul.mubr.f32.vlgmr.msra.gmra.mrb[2].mxu0 %v1057_v16 }
 0x22f   :  { %1701 = vmatpush3.bf16.msra.mxu0 %v1685_v60  ;;  %1645 = vmatprep.mubr.msk.f32.mxu0 %vm1763_vm2, %v1764_v7 }
 0x236   :  { %1646 = vmatmul.mubr.f32.vlgmr.msra.gmra.mrb[2].mxu0 %v1057_v16 }
 0x309   :  { %v1445_v22 = vpop.f32.mrb[2].mxu0 }
 0x30a   :  { %v1705_v23 = vadd.f32 %v1467_v21, %v1445_v22  ;;  %v1647_v24 = vpop.f32.mrb[3].mxu0 }
 0x30c   :  { %1450 = vst.msk [vmem:[#allocation2] sm:$0xff] %vm1449_vm4, %v1705_v23 }
 0x30d   :  { %1749 = shalt.err (!%p1746_p4)
}
 0x30e   :  { %s1750_s20 = scalar_lea.hbm %s1911_s7, 128 }
 0x30f   :  { %p1751_p5 = scmp.ne.s32.totalorder %s1911_s7, %s1750_s20  ;;  %p1754_p6 = scmp.lt.u32.totalorder %s1750_s20, %s1911_s7 }
 0x311   :  { %p1756_p7 = pnand %p1754_p6, %p1751_p5 }
 0x313   :  { %1759 = shalt.err (!%p1756_p7)
}
 0x314   :  { %1460 = dma.vmem_to_hbm [thread:$0]  %s1458_s16, 128, %s1911_s7, [#allocation3]  }
 0x315   :  { %1760 = dma.done.wait [#allocation3], 128  }
 0x316   :  { %1761 = vsyncadd [#allocation3], 4294967168 }
 0x317   :  { %1464 = vsyncpa [#allocation3], 1 }

</bundles_post_ra>
